<compile_context>
chip_gen: v6e
topology: v6e:2x2x1
jax: 0.10.0
libtpu: 0.0.40
codegen_flags: <defaults>
</compile_context>

<pallas_src>
import jax
import jax.numpy as jnp
from jax.experimental import pallas as pl
from jax.experimental.pallas import tpu as pltpu


def _round_up(x, m):
    return ((x + m - 1) // m) * m


def cnnnet_kernel(wc_ref, bc_ref, wf_ref, bf_ref, x_ref, o_ref):
    # wc_ref: (12,) f32 SMEM  -- conv weight, row-major (3 out, 4 in)
    # bc_ref: (3,)  f32 SMEM
    # wf_ref: (9,)  f32 SMEM  -- fc weight, row-major (3 out, 3 in)
    # bf_ref: (3,)  f32 SMEM
    # x_ref : (4, T) f32 VMEM -- batch on the lane axis
    # o_ref : (3, T) f32 VMEM
    x = x_ref[...]                                    # (4, T)
    rows = [x[k:k + 1, :] for k in range(4)]          # 4 x (1, T)

    # Layer 1: "conv" == 4-wide dot per output channel, on the VPU.
    h = []
    for c in range(3):
        acc = rows[0] * wc_ref[4 * c + 0]
        for k in range(1, 4):
            acc = acc + rows[k] * wc_ref[4 * c + k]
        acc = acc + bc_ref[c]
        h.append(jnp.maximum(acc, 0.0))               # ReLU

    # Layer 2: Linear(3, 3), also on the VPU; one lane-dense row store each.
    for j in range(3):
        acc = h[0] * wf_ref[3 * j + 0]
        for c in range(1, 3):
            acc = acc + h[c] * wf_ref[3 * j + c]
        acc = acc + bf_ref[j]
        o_ref[j:j + 1, :] = acc.astype(o_ref.dtype)


def cnnnet_forward(x, conv_w, conv_b, fc_w, fc_b, *, tile_n=4096):
    """x: any shape whose element count is divisible by 4 (PyTorch view(-1,1,2,2))."""
    x_flat = jnp.asarray(x, jnp.float32).reshape(-1, 4)   # (N, 1*2*2)
    n = x_flat.shape[0]

    # Lane-dense tile size: multiple of 128, capped at tile_n.
    tn = min(int(tile_n), _round_up(max(n, 1), 128))
    tn = _round_up(tn, 128)
    n_pad = _round_up(n, tn)
    num_tiles = n_pad // tn

    # Batch -> lane axis, zero-padded tail.
    xt = jnp.zeros((4, n_pad), jnp.float32).at[:, :n].set(x_flat.T)

    # Tiny weights/biases as flat f32 SMEM arrays (scalar reads in-kernel).
    wc = jnp.asarray(conv_w, jnp.float32).reshape(-1)     # (12,)  = (3,1,2,2) row-major
    bc = jnp.asarray(conv_b, jnp.float32).reshape(-1)     # (3,)
    wf = jnp.asarray(fc_w, jnp.float32).reshape(-1)       # (9,)   = (3,3) row-major
    bf = jnp.asarray(fc_b, jnp.float32).reshape(-1)       # (3,)

    smem = pl.BlockSpec(memory_space=pltpu.MemorySpace.SMEM)
    out_t = pl.pallas_call(
        cnnnet_kernel,
        out_shape=jax.ShapeDtypeStruct((3, n_pad), jnp.float32),
        grid=(num_tiles,),
        in_specs=[smem, smem, smem, smem,
                  pl.BlockSpec((4, tn), lambda i: (0, i))],
        out_specs=pl.BlockSpec((3, tn), lambda i: (0, i)),
        compiler_params=pltpu.CompilerParams(
            dimension_semantics=("parallel",),
            vmem_limit_bytes=32 * 1024 * 1024,
        ),
    )(wc, bc, wf, bf, xt)

    return out_t[:, :n].T                                 # (N, 3)


def reference_forward(x, conv_w, conv_b, fc_w, fc_b):
    """Plain-JAX reference mirroring the PyTorch forward."""
    x_flat = jnp.asarray(x, jnp.float32).reshape(-1, 4)
    h = x_flat @ conv_w.reshape(3, 4).T + conv_b.reshape(1, 3)
    h = jnp.maximum(h, 0.0)
    return h @ fc_w.T + fc_b.reshape(1, 3)


if __name__ == "__main__":
    key = jax.random.PRNGKey(0)
    kx, k1, k2, k3, k4 = jax.random.split(key, 5)

    # Deterministic synthetic parameters (shapes from CNNNet.__init__)
    conv_w = jax.random.normal(k1, (3, 1, 2, 2), dtype=jnp.float32) * 0.5  # Conv2d(1,3,2)
    conv_b = jax.random.normal(k2, (3,), dtype=jnp.float32) * 0.1
    fc_w = jax.random.normal(k3, (3, 3), dtype=jnp.float32) * 0.5          # Linear(3,3)
    fc_b = jax.random.normal(k4, (3,), dtype=jnp.float32) * 0.1

    # Small batch: 8 samples of 4 values each -> view(-1,1,2,2) gives N=8.
    x_small = jax.random.normal(kx, (8, 4), dtype=jnp.float32)
    out_small = jax.block_until_ready(
        cnnnet_forward(x_small, conv_w, conv_b, fc_w, fc_b))
    ref_small = reference_forward(x_small, conv_w, conv_b, fc_w, fc_b)
    assert out_small.shape == (8, 3)
    assert jnp.allclose(out_small, ref_small, atol=1e-5, rtol=1e-5)

    # Larger batch with a small tile to exercise multiple grid steps + padded tail.
    x_big = jax.random.normal(kx, (300, 4), dtype=jnp.float32)
    out_big = jax.block_until_ready(
        cnnnet_forward(x_big, conv_w, conv_b, fc_w, fc_b, tile_n=128))
    ref_big = reference_forward(x_big, conv_w, conv_b, fc_w, fc_b)
    assert out_big.shape == (300, 3)
    assert jnp.allclose(out_big, ref_big, atol=1e-5, rtol=1e-5)

    print("KERNEL_OK")
</pallas_src>

<mosaic_0001>
module attributes {stable_mosaic.version = 11 : i64} {
  func.func @cnnnet_kernel(%arg0: i32, %arg1: memref<12xf32, #tpu.memory_space<smem>>, %arg2: memref<3xf32, #tpu.memory_space<smem>>, %arg3: memref<9xf32, #tpu.memory_space<smem>>, %arg4: memref<3xf32, #tpu.memory_space<smem>>, %arg5: memref<4x128xf32, #tpu.memory_space<vmem>>, %arg6: memref<3x128xf32, #tpu.memory_space<vmem>>) attributes {dimension_semantics = [#tpu.dimension_semantics<parallel>], iteration_bounds = array<i64: 1>, scalar_prefetch = 0 : i64, scratch_operands = 0 : i64, tpu.core_type = #tpu.core_type<tc>, window_params = [{transform_indices = @transform_0, window_bounds = array<i64: 12>}, {transform_indices = @transform_1, window_bounds = array<i64: 3>}, {transform_indices = @transform_2, window_bounds = array<i64: 9>}, {transform_indices = @transform_3, window_bounds = array<i64: 3>}, {transform_indices = @transform_4, window_bounds = array<i64: 4, 128>}, {transform_indices = @transform_5, window_bounds = array<i64: 3, 128>}]} {
    %c0 = arith.constant 0 : index
    %c0_0 = arith.constant 0 : index
    %0 = vector.load %arg5[%c0, %c0_0] : memref<4x128xf32, #tpu.memory_space<vmem>>, vector<4x128xf32>
    %1 = vector.extract_strided_slice %0 {offsets = [0, 0], sizes = [1, 128], strides = [1, 1]} : vector<4x128xf32> to vector<1x128xf32>
    %2 = vector.extract_strided_slice %0 {offsets = [1, 0], sizes = [1, 128], strides = [1, 1]} : vector<4x128xf32> to vector<1x128xf32>
    %3 = vector.extract_strided_slice %0 {offsets = [2, 0], sizes = [1, 128], strides = [1, 1]} : vector<4x128xf32> to vector<1x128xf32>
    %4 = vector.extract_strided_slice %0 {offsets = [3, 0], sizes = [1, 128], strides = [1, 1]} : vector<4x128xf32> to vector<1x128xf32>
    %c0_1 = arith.constant 0 : index
    %5 = memref.load %arg1[%c0_1] : memref<12xf32, #tpu.memory_space<smem>>
    %6 = vector.broadcast %5 : f32 to vector<1x128xf32>
    %7 = arith.mulf %1, %6 : vector<1x128xf32>
    %c1 = arith.constant 1 : index
    %8 = memref.load %arg1[%c1] : memref<12xf32, #tpu.memory_space<smem>>
    %9 = vector.broadcast %8 : f32 to vector<1x128xf32>
    %10 = arith.mulf %2, %9 : vector<1x128xf32>
    %11 = arith.addf %7, %10 : vector<1x128xf32>
    %c2 = arith.constant 2 : index
    %12 = memref.load %arg1[%c2] : memref<12xf32, #tpu.memory_space<smem>>
    %13 = vector.broadcast %12 : f32 to vector<1x128xf32>
    %14 = arith.mulf %3, %13 : vector<1x128xf32>
    %15 = arith.addf %11, %14 : vector<1x128xf32>
    %c3 = arith.constant 3 : index
    %16 = memref.load %arg1[%c3] : memref<12xf32, #tpu.memory_space<smem>>
    %17 = vector.broadcast %16 : f32 to vector<1x128xf32>
    %18 = arith.mulf %4, %17 : vector<1x128xf32>
    %19 = arith.addf %15, %18 : vector<1x128xf32>
    %c0_2 = arith.constant 0 : index
    %20 = memref.load %arg2[%c0_2] : memref<3xf32, #tpu.memory_space<smem>>
    %21 = vector.broadcast %20 : f32 to vector<1x128xf32>
    %22 = arith.addf %19, %21 : vector<1x128xf32>
    %cst = arith.constant 0.000000e+00 : f32
    %23 = vector.broadcast %cst : f32 to vector<1x128xf32>
    %24 = arith.maximumf %22, %23 : vector<1x128xf32>
    %c4 = arith.constant 4 : index
    %25 = memref.load %arg1[%c4] : memref<12xf32, #tpu.memory_space<smem>>
    %26 = vector.broadcast %25 : f32 to vector<1x128xf32>
    %27 = arith.mulf %1, %26 : vector<1x128xf32>
    %c5 = arith.constant 5 : index
    %28 = memref.load %arg1[%c5] : memref<12xf32, #tpu.memory_space<smem>>
    %29 = vector.broadcast %28 : f32 to vector<1x128xf32>
    %30 = arith.mulf %2, %29 : vector<1x128xf32>
    %31 = arith.addf %27, %30 : vector<1x128xf32>
    %c6 = arith.constant 6 : index
    %32 = memref.load %arg1[%c6] : memref<12xf32, #tpu.memory_space<smem>>
    %33 = vector.broadcast %32 : f32 to vector<1x128xf32>
    %34 = arith.mulf %3, %33 : vector<1x128xf32>
    %35 = arith.addf %31, %34 : vector<1x128xf32>
    %c7 = arith.constant 7 : index
    %36 = memref.load %arg1[%c7] : memref<12xf32, #tpu.memory_space<smem>>
    %37 = vector.broadcast %36 : f32 to vector<1x128xf32>
    %38 = arith.mulf %4, %37 : vector<1x128xf32>
    %39 = arith.addf %35, %38 : vector<1x128xf32>
    %c1_3 = arith.constant 1 : index
    %40 = memref.load %arg2[%c1_3] : memref<3xf32, #tpu.memory_space<smem>>
    %41 = vector.broadcast %40 : f32 to vector<1x128xf32>
    %42 = arith.addf %39, %41 : vector<1x128xf32>
    %cst_4 = arith.constant 0.000000e+00 : f32
    %43 = vector.broadcast %cst_4 : f32 to vector<1x128xf32>
    %44 = arith.maximumf %42, %43 : vector<1x128xf32>
    %c8 = arith.constant 8 : index
    %45 = memref.load %arg1[%c8] : memref<12xf32, #tpu.memory_space<smem>>
    %46 = vector.broadcast %45 : f32 to vector<1x128xf32>
    %47 = arith.mulf %1, %46 : vector<1x128xf32>
    %c9 = arith.constant 9 : index
    %48 = memref.load %arg1[%c9] : memref<12xf32, #tpu.memory_space<smem>>
    %49 = vector.broadcast %48 : f32 to vector<1x128xf32>
    %50 = arith.mulf %2, %49 : vector<1x128xf32>
    %51 = arith.addf %47, %50 : vector<1x128xf32>
    %c10 = arith.constant 10 : index
    %52 = memref.load %arg1[%c10] : memref<12xf32, #tpu.memory_space<smem>>
    %53 = vector.broadcast %52 : f32 to vector<1x128xf32>
    %54 = arith.mulf %3, %53 : vector<1x128xf32>
    %55 = arith.addf %51, %54 : vector<1x128xf32>
    %c11 = arith.constant 11 : index
    %56 = memref.load %arg1[%c11] : memref<12xf32, #tpu.memory_space<smem>>
    %57 = vector.broadcast %56 : f32 to vector<1x128xf32>
    %58 = arith.mulf %4, %57 : vector<1x128xf32>
    %59 = arith.addf %55, %58 : vector<1x128xf32>
    %c2_5 = arith.constant 2 : index
    %60 = memref.load %arg2[%c2_5] : memref<3xf32, #tpu.memory_space<smem>>
    %61 = vector.broadcast %60 : f32 to vector<1x128xf32>
    %62 = arith.addf %59, %61 : vector<1x128xf32>
    %cst_6 = arith.constant 0.000000e+00 : f32
    %63 = vector.broadcast %cst_6 : f32 to vector<1x128xf32>
    %64 = arith.maximumf %62, %63 : vector<1x128xf32>
    %c0_7 = arith.constant 0 : index
    %65 = memref.load %arg3[%c0_7] : memref<9xf32, #tpu.memory_space<smem>>
    %66 = vector.broadcast %65 : f32 to vector<1x128xf32>
    %67 = arith.mulf %24, %66 : vector<1x128xf32>
    %c1_8 = arith.constant 1 : index
    %68 = memref.load %arg3[%c1_8] : memref<9xf32, #tpu.memory_space<smem>>
    %69 = vector.broadcast %68 : f32 to vector<1x128xf32>
    %70 = arith.mulf %44, %69 : vector<1x128xf32>
    %71 = arith.addf %67, %70 : vector<1x128xf32>
    %c2_9 = arith.constant 2 : index
    %72 = memref.load %arg3[%c2_9] : memref<9xf32, #tpu.memory_space<smem>>
    %73 = vector.broadcast %72 : f32 to vector<1x128xf32>
    %74 = arith.mulf %64, %73 : vector<1x128xf32>
    %75 = arith.addf %71, %74 : vector<1x128xf32>
    %c0_10 = arith.constant 0 : index
    %76 = memref.load %arg4[%c0_10] : memref<3xf32, #tpu.memory_space<smem>>
    %77 = vector.broadcast %76 : f32 to vector<1x128xf32>
    %78 = arith.addf %75, %77 : vector<1x128xf32>
    %c0_11 = arith.constant 0 : index
    %c0_12 = arith.constant 0 : index
    %79 = vector.load %arg6[%c0_11, %c0_12] : memref<3x128xf32, #tpu.memory_space<vmem>>, vector<1x128xf32>
    tpu.vector_store %arg6[%c0_11, %c0_12], %78 {strides = array<i32>} : memref<3x128xf32, #tpu.memory_space<vmem>>, vector<1x128xf32>,
    %c3_13 = arith.constant 3 : index
    %80 = memref.load %arg3[%c3_13] : memref<9xf32, #tpu.memory_space<smem>>
    %81 = vector.broadcast %80 : f32 to vector<1x128xf32>
    %82 = arith.mulf %24, %81 : vector<1x128xf32>
    %c4_14 = arith.constant 4 : index
    %83 = memref.load %arg3[%c4_14] : memref<9xf32, #tpu.memory_space<smem>>
    %84 = vector.broadcast %83 : f32 to vector<1x128xf32>
    %85 = arith.mulf %44, %84 : vector<1x128xf32>
    %86 = arith.addf %82, %85 : vector<1x128xf32>
    %c5_15 = arith.constant 5 : index
    %87 = memref.load %arg3[%c5_15] : memref<9xf32, #tpu.memory_space<smem>>
    %88 = vector.broadcast %87 : f32 to vector<1x128xf32>
    %89 = arith.mulf %64, %88 : vector<1x128xf32>
    %90 = arith.addf %86, %89 : vector<1x128xf32>
    %c1_16 = arith.constant 1 : index
    %91 = memref.load %arg4[%c1_16] : memref<3xf32, #tpu.memory_space<smem>>
    %92 = vector.broadcast %91 : f32 to vector<1x128xf32>
    %93 = arith.addf %90, %92 : vector<1x128xf32>
    %c1_17 = arith.constant 1 : index
    %c0_18 = arith.constant 0 : index
    %94 = vector.load %arg6[%c1_17, %c0_18] : memref<3x128xf32, #tpu.memory_space<vmem>>, vector<1x128xf32>
    tpu.vector_store %arg6[%c1_17, %c0_18], %93 {strides = array<i32>} : memref<3x128xf32, #tpu.memory_space<vmem>>, vector<1x128xf32>,
    %c6_19 = arith.constant 6 : index
    %95 = memref.load %arg3[%c6_19] : memref<9xf32, #tpu.memory_space<smem>>
    %96 = vector.broadcast %95 : f32 to vector<1x128xf32>
    %97 = arith.mulf %24, %96 : vector<1x128xf32>
    %c7_20 = arith.constant 7 : index
    %98 = memref.load %arg3[%c7_20] : memref<9xf32, #tpu.memory_space<smem>>
    %99 = vector.broadcast %98 : f32 to vector<1x128xf32>
    %100 = arith.mulf %44, %99 : vector<1x128xf32>
    %101 = arith.addf %97, %100 : vector<1x128xf32>
    %c8_21 = arith.constant 8 : index
    %102 = memref.load %arg3[%c8_21] : memref<9xf32, #tpu.memory_space<smem>>
    %103 = vector.broadcast %102 : f32 to vector<1x128xf32>
    %104 = arith.mulf %64, %103 : vector<1x128xf32>
    %105 = arith.addf %101, %104 : vector<1x128xf32>
    %c2_22 = arith.constant 2 : index
    %106 = memref.load %arg4[%c2_22] : memref<3xf32, #tpu.memory_space<smem>>
    %107 = vector.broadcast %106 : f32 to vector<1x128xf32>
    %108 = arith.addf %105, %107 : vector<1x128xf32>
    %c2_23 = arith.constant 2 : index
    %c0_24 = arith.constant 0 : index
    %109 = vector.load %arg6[%c2_23, %c0_24] : memref<3x128xf32, #tpu.memory_space<vmem>>, vector<1x128xf32>
    tpu.vector_store %arg6[%c2_23, %c0_24], %108 {strides = array<i32>} : memref<3x128xf32, #tpu.memory_space<vmem>>, vector<1x128xf32>,
    return
  }
  func.func @transform_0(%arg0: i32) -> i32 {
    %c0_i32 = arith.constant 0 : i32
    %c0_i32_0 = arith.constant 0 : i32
    return %c0_i32 : i32
  }
  func.func @transform_1(%arg0: i32) -> i32 {
    %c0_i32 = arith.constant 0 : i32
    %c0_i32_0 = arith.constant 0 : i32
    return %c0_i32 : i32
  }
  func.func @transform_2(%arg0: i32) -> i32 {
    %c0_i32 = arith.constant 0 : i32
    %c0_i32_0 = arith.constant 0 : i32
    return %c0_i32 : i32
  }
  func.func @transform_3(%arg0: i32) -> i32 {
    %c0_i32 = arith.constant 0 : i32
    %c0_i32_0 = arith.constant 0 : i32
    return %c0_i32 : i32
  }
  func.func @transform_4(%arg0: i32) -> (i32, i32) {
    %c0_i32 = arith.constant 0 : i32
    %c0_i32_0 = arith.constant 0 : i32
    return %c0_i32, %arg0 : i32, i32
  }
  func.func @transform_5(%arg0: i32) -> (i32, i32) {
    %c0_i32 = arith.constant 0 : i32
    %c0_i32_0 = arith.constant 0 : i32
    return %c0_i32, %arg0 : i32, i32
  }
}

</mosaic_0001>

<bundles_post_ra>
// kernel: tpu_custom_call.1
= control target key start
LH: loop header
LB: loop body
LE: loop exit
PB: predicated region body
PF: predicated region fallthrough
CT: control target
= control target key end

     0   :  { %10 = vsyncpa [#allocation4], 0  ;;  %s394_s0 = inlined_call_operand.hbm [shape: f32[12], index: 0, kind: input, shape index: {}]   ;;  %s395_s1 = inlined_call_operand.vmem [shape: f32[3], index: 1, kind: input, shape index: {}]   ;;  %s396_s2 = inlined_call_operand.vmem [shape: f32[9], index: 2, kind: input, shape index: {}]   ;;  %s397_s3 = inlined_call_operand.vmem [shape: f32[3], index: 3, kind: input, shape index: {}]   ;;  %s398_s4 = inlined_call_operand.vmem [shape: f32[4,128], index: 4, kind: input, shape index: {}]   ;;  %s399_s5 = inlined_call_operand.hbm [shape: f32[3,128], index: 5, kind: output, shape index: {}]  }
   0x1   :  { %11 = vsyncpa [#allocation5], 0 }
   0x2   :  { %12 = vsyncpa [#allocation8], 0  ;;  %s38_s20 = sshll.u32 %s396_s2, 4  ;;  %s39_s20 = int_to_ptr.vmem [resolvable:$true] %s38_s20 }
   0x3   :  { %13 = vsyncpa [#allocation3], 0  ;;  %s242_s21 = scalar_lea.vmem %s39_s20, 16  ;;  %p247_p1 = scmp.lt.s32.totalorder %s39_s20, %s39_s20 }
   0x4   :  { %p243_p0 = scmp.ne.s32.totalorder %s39_s20, %s242_s21  ;;  %p248_p2 = scmp.lt.s32.totalorder %s242_s21, %s242_s21 }
   0x6   :  { %p249_p3 = por %p248_p2, %p247_p1 }
   0x8   :  { %p250_p4 = pnand %p249_p3, %p243_p0 }
   0xa   :  { %253 = shalt.err (!%p250_p4)
}
   0xb   :  { %s314_s22 = smov [#allocation7]   ;;  %s315_s23 = smov [#allocation2]  }
   0xc   :  { %41 = dma.vmem_to_smem %s39_s20, 16, %s314_s22, [#allocation8]  }
   0xd   :  { %21 = dma.hbm_to_smem %s394_s0, 16, %s315_s23, [#allocation4]  }
   0xe   :  { %s28_s2 = sshll.u32 %s395_s1, 4  ;;  %s48_s30 = sshll.u32 %s397_s3, 4  ;;  %s29_s2 = int_to_ptr.vmem [resolvable:$true] %s28_s2  ;;  %s49_s30 = int_to_ptr.vmem [resolvable:$true] %s48_s30 }
   0xf   :  { %s262_s6 = scalar_lea.vmem %s29_s2, 16  ;;  %p267_p6 = scmp.lt.s32.totalorder %s29_s2, %s29_s2 }
  0x10   :  { %p263_p5 = scmp.ne.s32.totalorder %s29_s2, %s262_s6  ;;  %p268_p7 = scmp.lt.s32.totalorder %s262_s6, %s262_s6 }
  0x12   :  { %p269_p8 = por %p268_p7, %p267_p6 }
  0x14   :  { %p270_p9 = pnand %p269_p8, %p263_p5 }
  0x16   :  { %273 = shalt.err (!%p270_p9)
}
  0x17   :  { %s316_s7 = smov [#allocation6]   ;;  %s274_s0 = scalar_lea.vmem %s49_s30, 16 }
  0x18   :  { %31 = dma.vmem_to_smem %s29_s2, 16, %s316_s7, [#allocation5]  }
  0x19   :  { %p275_p10 = scmp.ne.s32.totalorder %s49_s30, %s274_s0  ;;  %p279_p11 = scmp.lt.s32.totalorder %s49_s30, %s49_s30 }
  0x1a   :  { %p280_p12 = scmp.lt.s32.totalorder %s274_s0, %s274_s0 }
  0x1c   :  { %p281_p13 = por %p280_p12, %p279_p11 }
  0x1e   :  { %p282_p0 = pnand %p281_p13, %p275_p10 }
  0x20   :  { %285 = shalt.err (!%p282_p0)
}
  0x21   :  { %s317_s1 = smov [#allocation9]  }
  0x22   :  { %51 = dma.vmem_to_smem %s49_s30, 16, %s317_s1, [#allocation8]  }
  0x23   :  { %306 = dma.done.wait [#allocation4], 16  }
  0x24   :  { %307 = vsyncadd [#allocation4], 4294967280 }
  0x25   :  { %308 = dma.done.wait [#allocation5], 16  }
  0x26   :  { %309 = vsyncadd [#allocation5], 4294967280 }
  0x27   :  { %310 = dma.done.wait [#allocation8], 32  }
  0x28   :  { %311 = vsyncadd [#allocation8], 4294967264 }
  0x29   :  { %66 = sfence }
  0x2a   :  { %s68_s3 = sld [smem:[#allocation2]]  ;;  %v67_v0 = vld [vmem:[%s398_s4] sm:$0xf]  ;;  %s318_s1 = smov [#allocation10]  }
  0x2b   :  { %s214_s8 = sld [smem:[#allocation2 + $0x1]] }
  0x2c   :  { %s215_s9 = sld [smem:[#allocation2 + $0x2]] }
  0x2d   :  { %s216_s10 = sld [smem:[#allocation2 + $0x3]] }
  0x2e   :  { %s361_s11 = sld [smem:[#allocation6]] }
  0x2f   :  { %s217_s14 = sld [smem:[#allocation2 + $0x4]] }
  0x30   :  { %v69_v1 = vstv %s68_s3  ;;  %s218_s15 = sld [smem:[#allocation2 + $0x5]]  ;;  %s203_s3 = sshll.u32 %s318_s1, 4  ;;  %s204_s3 = int_to_ptr.vmem [resolvable:$true] %s203_s3 }
  0x31   :  { %v72_v2 = vstv %s214_s8  ;;  %s219_s16 = sld [smem:[#allocation2 + $0x6]]  ;;  %v70_v3 = vmul.f32 %v69_v1, %v67_v0  ;;  %s286_s8 = scalar_lea.vmem %s204_s3, 64 }
  0x32   :  { %v73_v4 = vmul.f32 %v72_v2, %v67_v0  ;;  %v79_v5 = vstv %s215_s9  ;;  %s220_s17 = sld [smem:[#allocation2 + $0x7]]  ;;  %p287_p1 = scmp.ne.s32.totalorder %s204_s3, %s286_s8 }
  0x33   :  { %v80_v6 = vmul.f32 %v79_v5, %v67_v0  ;;  %v86_v7 = vstv %s216_s10  ;;  %s366_s18 = sld [smem:[#allocation6 + $0x1]]  ;;  %p291_p2 = scmp.lt.s32.totalorder %s204_s3, %s204_s3 }
  0x34   :  { %v75_v8 = vrot.slane %v73_v4, 1  ;;  %v87_v9 = vmul.f32 %v86_v7, %v67_v0  ;;  %s222_s19 = sld [smem:[#allocation2 + $0x8]]  ;;  %v93_v21 = vstv %s361_s11  ;;  %p292_p3 = scmp.lt.s32.totalorder %s286_s8, %s286_s8 }
  0x35   :  { %v82_v10 = vrot.slane %v80_v6, 2  ;;  %v97_v11 = vstv %s217_s14  ;;  %s223_s4 = sld [smem:[#allocation2 + $0x9]] }
  0x36   :  { %v77_v12 = vadd.f32 %v75_v8, %v70_v3  ;;  %v89_v13 = vrot.slane %v87_v9, 3  ;;  %v100_v14 = vstv %s218_s15  ;;  %s224_s20 = sld [smem:[#allocation2 + $0xa]]  ;;  %v98_v15 = vmul.f32 %v97_v11, %v67_v0  ;;  %p293_p4 = por %p292_p3, %p291_p2 }
  0x37   :  { %v101_v16 = vmul.f32 %v100_v14, %v67_v0  ;;  %v107_v17 = vstv %s219_s16  ;;  %s225_s21 = sld [smem:[#allocation2 + $0xb]] }
  0x38   :  { %v84_v18 = vadd.f32 %v82_v10, %v77_v12  ;;  %v108_v19 = vmul.f32 %v107_v17, %v67_v0  ;;  %v114_v20 = vstv %s220_s17  ;;  %s368_s22 = sld [smem:[#allocation6 + $0x2]]  ;;  %p294_p5 = pnand %p293_p4, %p287_p1 }
  0x39   :  { %v103_v22 = vrot.slane %v101_v16, 1  ;;  %v115_v23 = vmul.f32 %v114_v20, %v67_v0  ;;  %s371_s23 = sld [smem:[#allocation7]]  ;;  %v121_v37 = vstv %s366_s18 }
  0x3a   :  { %v91_v24 = vadd.f32 %v89_v13, %v84_v18  ;;  %v110_v25 = vrot.slane %v108_v19, 2  ;;  %v125_v26 = vstv %s222_s19  ;;  %s373_s24 = sld [smem:[#allocation7 + $0x1]] }
  0x3b   :  { %v105_v27 = vadd.f32 %v103_v22, %v98_v15  ;;  %v117_v28 = vrot.slane %v115_v23, 3  ;;  %v128_v29 = vstv %s223_s4  ;;  %s375_s25 = sld [smem:[#allocation7 + $0x2]]  ;;  %v126_v31 = vmul.f32 %v125_v26, %v67_v0 }
  0x3c   :  { %v94_v30 = vadd.f32 %v93_v21, %v91_v24  ;;  %v129_v32 = vmul.f32 %v128_v29, %v67_v0  ;;  %v135_v33 = vstv %s224_s20  ;;  %s377_s26 = sld [smem:[#allocation9]] }
  0x3d   :  { %v112_v34 = vadd.f32 %v110_v25, %v105_v27  ;;  %v136_v35 = vmul.f32 %v135_v33, %v67_v0  ;;  %v142_v36 = vstv %s225_s21  ;;  %s229_s27 = sld [smem:[#allocation7 + $0x3]] }
  0x3e   :  { %v131_v38 = vrot.slane %v129_v32, 1  ;;  %v143_v39 = vmul.f32 %v142_v36, %v67_v0  ;;  %s230_s2 = sld [smem:[#allocation7 + $0x4]]  ;;  %v95_v40 = vmax.f32 %v94_v30, 0.0  ;;  %v149_v50 = vstv %s368_s22 }
  0x3f   :  { %v119_v41 = vadd.f32 %v117_v28, %v112_v34  ;;  %v138_v42 = vrot.slane %v136_v35, 2  ;;  %s380_s28 = sld [smem:[#allocation7 + $0x5]]  ;;  %v153_v45 = vstv %s371_s23 }
  0x40   :  { %v133_v43 = vadd.f32 %v131_v38, %v126_v31  ;;  %v145_v44 = vrot.slane %v143_v39, 3  ;;  %s383_s29 = sld [smem:[#allocation9 + $0x1]]  ;;  %v156_v48 = vstv %s373_s24  ;;  %v154_v51 = vmul.f32 %v153_v45, %v95_v40 }
  0x41   :  { %v122_v46 = vadd.f32 %v121_v37, %v119_v41  ;;  %s233_s30 = sld [smem:[#allocation7 + $0x6]]  ;;  %v160_v60 = vstv %s375_s25 }
  0x42   :  { %v140_v47 = vadd.f32 %v138_v42, %v133_v43  ;;  %s234_s6 = sld [smem:[#allocation7 + $0x7]]  ;;  %v164_v8 = vstv %s377_s26 }
  0x43   :  { %v123_v49 = vmax.f32 %v122_v46, 0.0  ;;  %v168_v52 = vstv %s229_s27  ;;  %s235_s7 = sld [smem:[#allocation7 + $0x8]] }
  0x44   :  { %v147_v53 = vadd.f32 %v145_v44, %v140_v47  ;;  %v169_v54 = vmul.f32 %v168_v52, %v95_v40  ;;  %v171_v55 = vstv %s230_s2  ;;  %s236_s0 = sld [smem:[#allocation9 + $0x2]] }
  0x45   :  { %v157_v56 = vmul.f32 %v156_v48, %v123_v49  ;;  %v172_v57 = vmul.f32 %v171_v55, %v123_v49  ;;  %v175_v61 = vstv %s380_s28 }
  0x46   :  { %v150_v58 = vadd.f32 %v149_v50, %v147_v53  ;;  %v179_v9 = vstv %s383_s29 }
  0x47   :  { %v158_v59 = vadd.f32 %v157_v56, %v154_v51  ;;  %v183_v62 = vstv %s233_s30  ;;  %v173_v0 = vadd.f32 %v172_v57, %v169_v54 }
  0x48   :  { %v151_v63 = vmax.f32 %v150_v58, 0.0  ;;  %v184_v1 = vmul.f32 %v183_v62, %v95_v40  ;;  %v186_v2 = vstv %s234_s6 }
  0x49   :  { %v187_v3 = vmul.f32 %v186_v2, %v123_v49  ;;  %v190_v4 = vstv %s235_s7 }
  0x4a   :  { %v161_v5 = vmul.f32 %v160_v60, %v151_v63  ;;  %v176_v6 = vmul.f32 %v175_v61, %v151_v63  ;;  %v191_v7 = vmul.f32 %v190_v4, %v151_v63  ;;  %v194_v13 = vstv %s236_s0 }
  0x4b   :  { %v188_v10 = vadd.f32 %v187_v3, %v184_v1 }
  0x4c   :  { %v162_v11 = vadd.f32 %v161_v5, %v158_v59  ;;  %v177_v12 = vadd.f32 %v176_v6, %v173_v0 }
  0x4d   :  { %v192_v14 = vadd.f32 %v191_v7, %v188_v10 }
  0x4e   :  { %v165_v15 = vadd.f32 %v164_v8, %v162_v11  ;;  %v180_v16 = vadd.f32 %v179_v9, %v177_v12 }
  0x4f   :  { %v195_v17 = vadd.f32 %v194_v13, %v192_v14 }
  0x50   :  { %166 = vst [vmem:[#allocation10] sm:$0x1] %v165_v15  ;;  %181 = vst [vmem:[#allocation10 + $0x1] sm:$0x1] %v180_v16 }
  0x51   :  { %196 = vst [vmem:[#allocation10 + $0x2] sm:$0x1] %v195_v17 }
  0x52   :  { %297 = shalt.err (!%p294_p5)
}
  0x53   :  { %206 = dma.vmem_to_hbm [thread:$0]  %s204_s3, 64, %s399_s5, [#allocation3]  }
  0x54   :  { %312 = dma.done.wait [#allocation3], 64  }
  0x55   :  { %313 = vsyncadd [#allocation3], 4294967232 }
  0x56   :  { %210 = vsyncpa [#allocation3], 1 }
  0x57   :  { %211 = vsyncpa [#allocation4], 1 }
  0x58   :  { %212 = vsyncpa [#allocation5], 1 }
  0x59   :  { %213 = vsyncpa [#allocation8], 1 }

</bundles_post_ra>
